<compile_context>
chip_gen: v7x
topology: tpu7x:2x2x1
jax: 0.10.0
libtpu: 0.0.40
codegen_flags: <defaults>
</compile_context>

<pallas_src>
import jax
import jax.numpy as jnp
from jax.experimental import pallas as pl
from jax.experimental.pallas import tpu as pltpu


def _copy_kernel(x_hbm_ref, o_hbm_ref, sem):
    """Single HBM->HBM DMA of the full flat (B, total) buffer."""
    cp = pltpu.make_async_copy(x_hbm_ref, o_hbm_ref, sem)
    cp.start()
    cp.wait()


def view_add_channels(x, params):
    """Pallas implementation of viewAddChannels.forward.

    x: (B, total_dim) contiguous.  Returns (B, *shape_) exactly like
    torch.Tensor.view(B, *shape_).
    """
    channels = params["channels"]
    C = params["input_dim"]
    Dx, Dy, Dz = params["Dx"], params["Dy"], params["Dz"]

    if channels == 1:
        spatial = (Dx,)
    elif channels == 2:
        spatial = (Dx, Dy)
    elif channels == 3:
        spatial = (Dx, Dy, Dz)
    else:
        raise ValueError("Not implemented.")

    prod_spatial = 1
    for d in spatial:
        prod_spatial *= d

    B, total = x.shape
    assert total == C * prod_spatial, (
        "input_dim * prod(spatial) must equal x.shape[1]"
    )

    itemsize = jnp.dtype(x.dtype).itemsize

    # Materialize the "view" as one bulk DMA at HBM bandwidth (no grid, no
    # VMEM staging).  The subsequent reshape is metadata-only.
    flat = pl.pallas_call(
        _copy_kernel,
        out_shape=jax.ShapeDtypeStruct((B, total), x.dtype),
        in_specs=[pl.BlockSpec(memory_space=pl.ANY)],
        out_specs=pl.BlockSpec(memory_space=pl.ANY),
        scratch_shapes=[pltpu.SemaphoreType.DMA(())],
        cost_estimate=pl.CostEstimate(
            flops=0,
            transcendentals=0,
            bytes_accessed=2 * B * total * itemsize,
        ),
    )(x)

    # Metadata-only split to the exact PyTorch output shape.
    return flat.reshape((B, C) + spatial)


if __name__ == "__main__":
    # channels == 2  ->  shape_ = (input_dim, Dx, Dy)
    params = dict(input_dim=4, Dx=8, Dy=128, Dz=1, channels=2)
    B = 2
    total_dim = params["input_dim"] * params["Dx"] * params["Dy"]

    key = jax.random.PRNGKey(0)
    x = jax.random.normal(key, (B, total_dim), dtype=jnp.float32)

    y = view_add_channels(x, params)
    y = jax.block_until_ready(y)

    # Reference semantics: x.view(B, input_dim, Dx, Dy)
    ref = jnp.reshape(x, (B, params["input_dim"], params["Dx"], params["Dy"]))

    assert y.shape == ref.shape, (y.shape, ref.shape)
    assert y.dtype == ref.dtype
    assert bool(jnp.array_equal(y, ref))

    print("KERNEL_OK")
</pallas_src>

<mosaic_0001>
module attributes {stable_mosaic.version = 11 : i64} {
  func.func @_copy_kernel(%arg0: memref<2x4096xf32, #tpu.memory_space<any>>, %arg1: memref<2x4096xf32, #tpu.memory_space<any>>, %arg2: memref<!tpu.dma_semaphore, #tpu.memory_space<semaphore_mem>>) attributes {dimension_semantics = [], scalar_prefetch = 0 : i64, scratch_operands = 1 : i64, tpu.core_type = #tpu.core_type<tc>} {
    tpu.enqueue_dma source(%arg0 : memref<2x4096xf32, #tpu.memory_space<any>>) target(%arg1 : memref<2x4096xf32, #tpu.memory_space<any>>) target_semaphore(%arg2 : memref<!tpu.dma_semaphore, #tpu.memory_space<semaphore_mem>>)
    tpu.wait_dma2 semaphore(%arg2 : memref<!tpu.dma_semaphore, #tpu.memory_space<semaphore_mem>>) src(%arg0 : memref<2x4096xf32, #tpu.memory_space<any>>) dst(%arg1 : memref<2x4096xf32, #tpu.memory_space<any>>)
    return
  }
}

</mosaic_0001>

<bundles_post_ra>
// kernel: tpu_custom_call.1
= control target key start
LH: loop header
LB: loop body
LE: loop exit
PB: predicated region body
PF: predicated region fallthrough
CT: control target
= control target key end

     0   :  { %s35_s6 = smov [#allocation2]   ;;  %s36_s7 = smov [#allocation3]   ;;  %s54_s0 = inlined_call_operand.hbm [shape: f32[2,4096], index: 0, kind: input, shape index: {}]   ;;  %s55_s1 = inlined_call_operand.hbm [shape: f32[2,4096], index: 1, kind: output, shape index: {}]  }
   0x1   :  { %s37_s8 = smov 0  }
   0x2   :  { %18 = dma.general %s54_s0, 1024, %s55_s1, %s35_s6, %s36_s7, [#allocation4], %s37_s8, 0  }
   0x3   :  { %33 = dma.done.wait [#allocation2], 1024 }
   0x4   :  { %34 = vsyncadd [#allocation2], 4294966272 }
   0x5   :  { %23 = vsyncmov [#allocation2] }
   0x8   :  { %s24_s13 = vpop.sfrf %23 }
   0x9   :  { %p29_p0 = scmp.ne.s32.totalorder %s24_s13, 0 }
   0xb   :  { %28 = shalt.err (%p29_p0)  }

</bundles_post_ra>
